<compile_context>
chip_gen: v7x
topology: tpu7x:2x2x1
jax: 0.10.0
libtpu: 0.0.40
codegen_flags: <defaults>
</compile_context>

<pallas_src>
import functools

import jax
import jax.numpy as jnp
import numpy as np
from jax.experimental import pallas as pl
from jax.experimental.pallas import tpu as pltpu


def _round_up(v, m):
    return (v + m - 1) // m * m


def _graph_attention_kernel(q_ref, k_ref, vp_ref, adj_ref, gamma_ref, bp_ref,
                            o_ref, *, dim):
    """Grid = (batch, query_tile). Pure attention; projections are hoisted.

    q_ref     : (1, H, Tq, d)  bf16   queries, softmax scale pre-folded
    k_ref     : (1, H, N, d)   bf16   keys (batch-indexed, q-constant block)
    vp_ref    : (1, H, N, P)   bf16   V with Wp folded per head, lane-padded
    adj_ref   : (1, Tq, N)     bf16   adjacency rows of this query tile
    gamma_ref : (1, Tq, 2)     f32    exp(gamma) (or gamma if use_exp=False)
    bp_ref    : (1, P)         f32    output-projection bias, lane-padded
    o_ref     : (1, Tq, dim)          output (true width, masked store)
    """
    q = q_ref[0]                                          # (H, Tq, d)
    k = k_ref[0]                                          # (H, N, d)
    vp = vp_ref[0]                                        # (H, N, P)

    gamma = gamma_ref[0]                                  # (Tq, 2) f32
    g0 = gamma[:, 0:1]                                    # (Tq, 1)
    g1 = gamma[:, 1:2]                                    # (Tq, 1)
    adj_term = g1 * adj_ref[0].astype(jnp.float32)        # (Tq, N) f32

    # Batched per-head QK^T on the MXU (f32 accumulation).
    s = jnp.einsum("hqd,hkd->hqk", q, k,
                   preferred_element_type=jnp.float32)    # (H, Tq, N)
    # gamma gate in f32 after the matmul; adjacency term shared across heads.
    s = g0[None] * s + adj_term[None]

    # Numerically stable softmax; denominator reciprocal on the EUP.
    s = s - jnp.max(s, axis=-1, keepdims=True)
    e = jnp.exp(s)
    inv = pl.reciprocal(jnp.sum(e, axis=-1, keepdims=True), approx=True)
    p = (e * inv).astype(jnp.bfloat16)                    # (H, Tq, N)

    # PV + output projection in one lane-dense contraction over N per head.
    ov = jnp.einsum("hqk,hkp->hqp", p, vp,
                    preferred_element_type=jnp.float32)   # (H, Tq, P)
    acc = jnp.sum(ov, axis=0) + bp_ref[...]               # (Tq, P)

    if dim == acc.shape[-1]:
        o_ref[0] = acc.astype(o_ref.dtype)
    else:
        o_ref[0] = acc[:, :dim].astype(o_ref.dtype)       # masked store, dim lanes


def graph_attention_pallas(x, adj, params, *, num_heads, dim, use_exp=True,
                           q_tile=256):
    """params are PyTorch-layout weights: (wqkv, wg, bg, wp, bp)."""
    B, N, C = x.shape
    assert C == dim
    hd = num_heads * dim
    out_pad = _round_up(dim, 128)
    scale = dim ** (-0.5)

    tq = min(q_tile, N)
    if N % tq != 0:
        # TODO(synk): ragged-tail masking when N is not divisible by the query tile.
        tq = N
    nq = N // tq

    wqkv, wg, bg, wp, bp = params
    x = jnp.asarray(x, jnp.float32)

    wqkv_t = jnp.asarray(wqkv, jnp.float32).T             # (C, 3*hd): [q|k|v]
    w_q = wqkv_t[:, :hd] * scale                          # softmax scale folded
    w_k = wqkv_t[:, hd:2 * hd]
    w_v = wqkv_t[:, 2 * hd:]

    # Q / K with heads on a leading axis: (B, H, N, dim) bf16.
    q = (x @ w_q).reshape(B, N, num_heads, dim).transpose(0, 2, 1, 3)
    k = (x @ w_k).reshape(B, N, num_heads, dim).transpose(0, 2, 1, 3)
    q = q.astype(jnp.bfloat16)
    k = k.astype(jnp.bfloat16)

    # Fold the output projection into V per head: wvp_h = w_v_h @ wp_h (C, dim),
    # zero-padded to 128 lanes; then vproj[b, h] = x[b] @ wvp_h == v_h @ wp_h.
    wp_t = jnp.asarray(wp, jnp.float32).T                 # (hd, dim_out)
    w_v_h = w_v.reshape(C, num_heads, dim)                # (C, H, dim)
    wp_h = wp_t.reshape(num_heads, dim, dim)              # (H, dim, dim_out)
    wvp = jnp.einsum("chd,hde->hce", w_v_h, wp_h)         # (H, C, dim_out)
    wvp = jnp.pad(wvp, ((0, 0), (0, 0), (0, out_pad - dim)))
    vproj = jnp.einsum("bnc,hcp->bhnp", x, wvp).astype(jnp.bfloat16)  # (B,H,N,P)

    # gamma (and its exp) once per node, kept in f32.
    gamma = x @ jnp.asarray(wg, jnp.float32).T + jnp.asarray(bg, jnp.float32)
    if use_exp:
        gamma = jnp.exp(gamma)                            # (B, N, 2)

    # bf16 adjacency: exact for 0/1 adjacency; halves the B*N*N HBM read.
    adj_bf16 = jnp.asarray(adj).astype(jnp.bfloat16)
    bp_pad = jnp.pad(jnp.asarray(bp, jnp.float32),
                     ((0, 0), (0, out_pad - dim)))        # (1, P)

    kernel = functools.partial(_graph_attention_kernel, dim=dim)

    # Working-set estimate (double-buffered inputs/output + f32 temporaries)
    # to size the scoped VMEM limit; cap at 48 MiB (v7x has 64 MiB/TC).
    est = (2 * (num_heads * tq * dim + num_heads * N * dim
                + num_heads * N * out_pad + tq * N) * 2
           + 2 * (tq * 2 + out_pad) * 4
           + 2 * tq * dim * 4
           + (3 * num_heads * tq * N + num_heads * tq * out_pad
              + 2 * tq * out_pad) * 4)
    vmem_limit = int(min(max(2 * est, 32 << 20), 48 << 20))

    out = pl.pallas_call(
        kernel,
        out_shape=jax.ShapeDtypeStruct((B, N, dim), x.dtype),
        grid=(B, nq),
        in_specs=[
            pl.BlockSpec((1, num_heads, tq, dim), lambda b, i: (b, 0, i, 0)),
            pl.BlockSpec((1, num_heads, N, dim), lambda b, i: (b, 0, 0, 0)),
            pl.BlockSpec((1, num_heads, N, out_pad), lambda b, i: (b, 0, 0, 0)),
            pl.BlockSpec((1, tq, N), lambda b, i: (b, i, 0)),
            pl.BlockSpec((1, tq, 2), lambda b, i: (b, i, 0)),
            pl.BlockSpec((1, out_pad), lambda b, i: (0, 0)),
        ],
        out_specs=pl.BlockSpec((1, tq, dim), lambda b, i: (b, i, 0)),
        compiler_params=pltpu.CompilerParams(
            dimension_semantics=("parallel", "parallel"),
            vmem_limit_bytes=vmem_limit),
    )(q, k, vproj, adj_bf16, gamma, bp_pad)
    return out


def graph_attention_ref(x, adj, params, *, num_heads, dim, use_exp=True):
    """Pure-JAX f32 reference mirroring the PyTorch forward exactly."""
    wqkv, wg, bg, wp, bp = params
    B, N, C = x.shape
    scale = dim ** (-0.5)

    qkv = x @ wqkv.T                                              # (B, N, 3*H*dim)
    qkv = qkv.reshape(B, N, 3, num_heads, dim).transpose(0, 3, 1, 2, 4)
    q, k, v = qkv[:, :, :, 0], qkv[:, :, :, 1], qkv[:, :, :, 2]   # (B, H, N, dim)

    attn = jnp.einsum("bhnd,bhmd->bhnm", q, k) * scale
    gamma = x @ wg.T + bg                                         # (B, N, 2)
    if use_exp:
        gamma = jnp.exp(gamma)
    gamma = jnp.broadcast_to(gamma[:, None], (B, num_heads, N, 2))
    adj_b = jnp.broadcast_to(adj[:, None], (B, num_heads, N, N))
    attn = gamma[..., 0:1] * attn + gamma[..., 1:2] * adj_b
    attn = jax.nn.softmax(attn, axis=-1)
    out = jnp.einsum("bhnm,bhmd->bhnd", attn, v)                  # (B, H, N, dim)
    out = out.transpose(0, 2, 1, 3).reshape(B, N, num_heads * dim)
    return out @ wp.T + bp


def init_params(key, dim, num_heads):
    """Deterministic synthetic init, PyTorch nn.Module layout (out, in)."""
    k1, k2, k3, k4, k5 = jax.random.split(key, 5)
    wqkv = jax.random.normal(k1, (3 * num_heads * dim, dim), jnp.float32) * 0.05
    wg = jax.random.uniform(k2, (2, dim), jnp.float32, 0.0, 0.01)
    bg = jax.random.normal(k3, (1, 2), jnp.float32) * 0.01
    wp = jax.random.normal(k4, (dim, num_heads * dim), jnp.float32) * 0.05
    bp = jax.random.normal(k5, (1, dim), jnp.float32) * 0.01
    return (wqkv, wg, bg, wp, bp)


if __name__ == "__main__":
    B, N, dim, num_heads = 2, 16, 32, 4

    key = jax.random.PRNGKey(0)
    kx, kadj, kp = jax.random.split(key, 3)

    x = jax.random.normal(kx, (B, N, dim), jnp.float32)
    # symmetric 0/1 adjacency with self loops (exact in bf16)
    a = (jax.random.uniform(kadj, (B, N, N)) > 0.6).astype(jnp.float32)
    adj = jnp.clip(a + a.transpose(0, 2, 1) + jnp.eye(N)[None], 0.0, 1.0)

    params = init_params(kp, dim, num_heads)

    out = graph_attention_pallas(x, adj, params, num_heads=num_heads, dim=dim)
    out = jax.block_until_ready(out)

    ref = graph_attention_ref(x, adj, params, num_heads=num_heads, dim=dim)
    # bf16 MXU operands (f32 accumulation) + approx softmax reciprocal ->
    # relaxed tolerance vs. the strict f32 reference.
    np.testing.assert_allclose(np.asarray(out), np.asarray(ref),
                               rtol=2e-2, atol=2e-2)

    print("KERNEL_OK")
</pallas_src>

<mosaic_0001>
module attributes {stable_mosaic.version = 11 : i64} {
  func.func @_graph_attention_kernel(%arg0: i32, %arg1: i32, %arg2: memref<1x4x16x32xbf16, #tpu.memory_space<vmem>>, %arg3: memref<1x4x16x32xbf16, #tpu.memory_space<vmem>>, %arg4: memref<1x4x16x128xbf16, #tpu.memory_space<vmem>>, %arg5: memref<1x16x16xbf16, #tpu.memory_space<vmem>>, %arg6: memref<1x16x2xf32, #tpu.memory_space<vmem>>, %arg7: memref<1x128xf32, #tpu.memory_space<vmem>>, %arg8: memref<1x16x32xf32, #tpu.memory_space<vmem>>) attributes {dimension_semantics = [#tpu.dimension_semantics<parallel>, #tpu.dimension_semantics<parallel>], iteration_bounds = array<i64: 2, 1>, scalar_prefetch = 0 : i64, scratch_operands = 0 : i64, tpu.core_type = #tpu.core_type<tc>, window_params = [{transform_indices = @transform_0, window_bounds = array<i64: 1, 4, 16, 32>}, {transform_indices = @transform_1, window_bounds = array<i64: 1, 4, 16, 32>}, {transform_indices = @transform_2, window_bounds = array<i64: 1, 4, 16, 128>}, {transform_indices = @transform_3, window_bounds = array<i64: 1, 16, 16>}, {transform_indices = @transform_4, window_bounds = array<i64: 1, 16, 2>}, {pipeline_mode = #tpu.pipeline_mode<synchronous>, transform_indices = @transform_5, window_bounds = array<i64: 1, 128>}, {transform_indices = @transform_6, window_bounds = array<i64: 1, 16, 32>}]} {
    %c0 = arith.constant 0 : index
    %c0_0 = arith.constant 0 : index
    %c0_1 = arith.constant 0 : index
    %c0_2 = arith.constant 0 : index
    %0 = vector.load %arg2[%c0, %c0_0, %c0_1, %c0_2] : memref<1x4x16x32xbf16, #tpu.memory_space<vmem>>, vector<1x4x16x32xbf16>
    %1 = vector.shape_cast %0 : vector<1x4x16x32xbf16> to vector<4x16x32xbf16>
    %c0_3 = arith.constant 0 : index
    %c0_4 = arith.constant 0 : index
    %c0_5 = arith.constant 0 : index
    %c0_6 = arith.constant 0 : index
    %2 = vector.load %arg3[%c0_3, %c0_4, %c0_5, %c0_6] : memref<1x4x16x32xbf16, #tpu.memory_space<vmem>>, vector<1x4x16x32xbf16>
    %3 = vector.shape_cast %2 : vector<1x4x16x32xbf16> to vector<4x16x32xbf16>
    %c0_7 = arith.constant 0 : index
    %c0_8 = arith.constant 0 : index
    %c0_9 = arith.constant 0 : index
    %c0_10 = arith.constant 0 : index
    %4 = vector.load %arg4[%c0_7, %c0_8, %c0_9, %c0_10] : memref<1x4x16x128xbf16, #tpu.memory_space<vmem>>, vector<1x4x16x128xbf16>
    %5 = vector.shape_cast %4 : vector<1x4x16x128xbf16> to vector<4x16x128xbf16>
    %c0_11 = arith.constant 0 : index
    %c0_12 = arith.constant 0 : index
    %c0_13 = arith.constant 0 : index
    %6 = vector.load %arg6[%c0_11, %c0_12, %c0_13] : memref<1x16x2xf32, #tpu.memory_space<vmem>>, vector<1x16x2xf32>
    %7 = vector.shape_cast %6 : vector<1x16x2xf32> to vector<16x2xf32>
    %8 = vector.extract_strided_slice %7 {offsets = [0, 0], sizes = [16, 1], strides = [1, 1]} : vector<16x2xf32> to vector<16x1xf32>
    %9 = vector.extract_strided_slice %7 {offsets = [0, 1], sizes = [16, 1], strides = [1, 1]} : vector<16x2xf32> to vector<16x1xf32>
    %c0_14 = arith.constant 0 : index
    %c0_15 = arith.constant 0 : index
    %c0_16 = arith.constant 0 : index
    %10 = vector.load %arg5[%c0_14, %c0_15, %c0_16] : memref<1x16x16xbf16, #tpu.memory_space<vmem>>, vector<1x16x16xbf16>
    %11 = vector.shape_cast %10 : vector<1x16x16xbf16> to vector<16x16xbf16>
    %12 = arith.extf %11 : vector<16x16xbf16> to vector<16x16xf32>
    %13 = vector.broadcast %9 : vector<16x1xf32> to vector<16x16xf32>
    %14 = arith.mulf %13, %12 : vector<16x16xf32>
    "tpu.trace_start"() <{level = 10 : i32, message = "hqd,hkd->hqk"}> : () -> ()
    %cst = arith.constant dense<0.000000e+00> : vector<4x16x16xf32>
    %15 = tpu.matmul %1, %3, %cst {dimension_numbers = #tpu.dot_dimension_numbers<[2], [2], [1], [1], [0, 0, 0, 1, 1, 1], [0], [0]>} : vector<4x16x32xbf16>, vector<4x16x32xbf16>, vector<4x16x16xf32> -> vector<4x16x16xf32>
    "tpu.trace_stop"() : () -> ()
    %16 = vector.shape_cast %8 : vector<16x1xf32> to vector<1x16x1xf32>
    %17 = vector.broadcast %16 : vector<1x16x1xf32> to vector<4x16x16xf32>
    %18 = arith.mulf %17, %15 : vector<4x16x16xf32>
    %19 = vector.shape_cast %14 : vector<16x16xf32> to vector<1x16x16xf32>
    %20 = vector.broadcast %19 : vector<1x16x16xf32> to vector<4x16x16xf32>
    %21 = arith.addf %18, %20 : vector<4x16x16xf32>
    %cst_17 = arith.constant dense<0xFF800000> : vector<4x16xf32>
    %22 = vector.multi_reduction <maximumf>, %21, %cst_17 [2] : vector<4x16x16xf32> to vector<4x16xf32>
    %23 = vector.shape_cast %22 : vector<4x16xf32> to vector<4x16x1xf32>
    %24 = vector.broadcast %23 : vector<4x16x1xf32> to vector<4x16x16xf32>
    %25 = arith.subf %21, %24 : vector<4x16x16xf32>
    %26 = math.exp %25 : vector<4x16x16xf32>
    %cst_18 = arith.constant dense<0.000000e+00> : vector<4x16xf32>
    %27 = vector.multi_reduction <add>, %26, %cst_18 [2] : vector<4x16x16xf32> to vector<4x16xf32>
    %28 = vector.shape_cast %27 : vector<4x16xf32> to vector<4x16x1xf32>
    %29 = tpu.reciprocal %28 {approx = true} : vector<4x16x1xf32> -> vector<4x16x1xf32>
    %30 = vector.broadcast %29 : vector<4x16x1xf32> to vector<4x16x16xf32>
    %31 = arith.mulf %26, %30 : vector<4x16x16xf32>
    %32 = arith.truncf %31 : vector<4x16x16xf32> to vector<4x16x16xbf16>
    "tpu.trace_start"() <{level = 10 : i32, message = "hqk,hkp->hqp"}> : () -> ()
    %cst_19 = arith.constant dense<0.000000e+00> : vector<4x16x128xf32>
    %33 = tpu.matmul %32, %5, %cst_19 {dimension_numbers = #tpu.dot_dimension_numbers<[2], [1], [1], [2], [0, 0, 0, 1, 1, 2], [0], [0]>} : vector<4x16x16xbf16>, vector<4x16x128xbf16>, vector<4x16x128xf32> -> vector<4x16x128xf32>
    "tpu.trace_stop"() : () -> ()
    %cst_20 = arith.constant dense<0.000000e+00> : vector<16x128xf32>
    %34 = vector.multi_reduction <add>, %33, %cst_20 [0] : vector<4x16x128xf32> to vector<16x128xf32>
    %c0_21 = arith.constant 0 : index
    %c0_22 = arith.constant 0 : index
    %35 = vector.load %arg7[%c0_21, %c0_22] : memref<1x128xf32, #tpu.memory_space<vmem>>, vector<1x128xf32>
    %36 = vector.broadcast %35 : vector<1x128xf32> to vector<16x128xf32>
    %37 = arith.addf %34, %36 : vector<16x128xf32>
    %38 = vector.extract_strided_slice %37 {offsets = [0, 0], sizes = [16, 32], strides = [1, 1]} : vector<16x128xf32> to vector<16x32xf32>
    %c0_23 = arith.constant 0 : index
    %c0_24 = arith.constant 0 : index
    %c0_25 = arith.constant 0 : index
    %39 = vector.load %arg8[%c0_23, %c0_24, %c0_25] : memref<1x16x32xf32, #tpu.memory_space<vmem>>, vector<1x16x32xf32>
    %40 = vector.shape_cast %39 : vector<1x16x32xf32> to vector<16x32xf32>
    %41 = vector.shape_cast %38 : vector<16x32xf32> to vector<1x16x32xf32>
    tpu.vector_store %arg8[%c0_23, %c0_24, %c0_25], %41 {strides = array<i32>} : memref<1x16x32xf32, #tpu.memory_space<vmem>>, vector<1x16x32xf32>,
    return
  }
  func.func @transform_0(%arg0: i32, %arg1: i32) -> (i32, i32, i32, i32) {
    %c0_i32 = arith.constant 0 : i32
    %c0_i32_0 = arith.constant 0 : i32
    %c0_i32_1 = arith.constant 0 : i32
    return %arg0, %c0_i32, %arg1, %c0_i32_0 : i32, i32, i32, i32
  }
  func.func @transform_1(%arg0: i32, %arg1: i32) -> (i32, i32, i32, i32) {
    %c0_i32 = arith.constant 0 : i32
    %c0_i32_0 = arith.constant 0 : i32
    %c0_i32_1 = arith.constant 0 : i32
    %c0_i32_2 = arith.constant 0 : i32
    return %arg0, %c0_i32, %c0_i32_0, %c0_i32_1 : i32, i32, i32, i32
  }
  func.func @transform_2(%arg0: i32, %arg1: i32) -> (i32, i32, i32, i32) {
    %c0_i32 = arith.constant 0 : i32
    %c0_i32_0 = arith.constant 0 : i32
    %c0_i32_1 = arith.constant 0 : i32
    %c0_i32_2 = arith.constant 0 : i32
    return %arg0, %c0_i32, %c0_i32_0, %c0_i32_1 : i32, i32, i32, i32
  }
  func.func @transform_3(%arg0: i32, %arg1: i32) -> (i32, i32, i32) {
    %c0_i32 = arith.constant 0 : i32
    %c0_i32_0 = arith.constant 0 : i32
    return %arg0, %arg1, %c0_i32 : i32, i32, i32
  }
  func.func @transform_4(%arg0: i32, %arg1: i32) -> (i32, i32, i32) {
    %c0_i32 = arith.constant 0 : i32
    %c0_i32_0 = arith.constant 0 : i32
    return %arg0, %arg1, %c0_i32 : i32, i32, i32
  }
  func.func @transform_5(%arg0: i32, %arg1: i32) -> (i32, i32) {
    %c0_i32 = arith.constant 0 : i32
    %c0_i32_0 = arith.constant 0 : i32
    %c0_i32_1 = arith.constant 0 : i32
    return %c0_i32, %c0_i32_0 : i32, i32
  }
  func.func @transform_6(%arg0: i32, %arg1: i32) -> (i32, i32, i32) {
    %c0_i32 = arith.constant 0 : i32
    %c0_i32_0 = arith.constant 0 : i32
    return %arg0, %arg1, %c0_i32 : i32, i32, i32
  }
}

</mosaic_0001>

<bundles_post_ra>
// kernel: tpu_custom_call.1
= control target key start
LH: loop header
LB: loop body
LE: loop exit
PB: predicated region body
PF: predicated region fallthrough
CT: control target
= control target key end

     0   :  { %s2066_s0 = inlined_call_operand.hbm [shape: bf16[2,4,16,32], index: 0, kind: input, shape index: {}]   ;;  %s2067_s1 = inlined_call_operand.hbm [shape: bf16[2,4,16,32], index: 1, kind: input, shape index: {}]   ;;  %s2068_s2 = inlined_call_operand.hbm [shape: bf16[2,4,16,128], index: 2, kind: input, shape index: {}]   ;;  %s2069_s3 = inlined_call_operand.vmem [shape: bf16[2,16,16], index: 3, kind: input, shape index: {}]   ;;  %s2070_s4 = inlined_call_operand.vmem [shape: f32[2,16,2], index: 4, kind: input, shape index: {}]   ;;  %s2071_s5 = inlined_call_operand.vmem [shape: f32[1,128], index: 5, kind: input, shape index: {}]   ;;  %s2072_s6 = inlined_call_operand.hbm [shape: f32[2,16,32], index: 6, kind: output, shape index: {}]  }
   0x1   :  { %2086 = sst [smem:[#allocation18_spill]] %s2067_s1 }
   0x2   :  { %11 = vsyncpa [#allocation3], 0 }
   0x3   :  { %13 = vsyncpa [#allocation3 + $0x1], 0 }
   0x4   :  { %14 = vsyncpa [#allocation6], 0 }
   0x5   :  { %16 = vsyncpa [#allocation6 + $0x1], 0 }
   0x6   :  { %17 = vsyncpa [#allocation4], 0 }
   0x7   :  { %19 = vsyncpa [#allocation4 + $0x1], 0  ;;  %s1701_s21 = smov 0   ;;  %s1703_s22 = smov 0  }
   0x8   :  { %s1705_s23 = smov 0   ;;  %s1707_s24 = smov 0  }
   0x9   :  { %s1709_s25 = smov 0   ;;  %s1711_s26 = smov 0  }
   0xa LB: > { %2087 = sst [smem:[#allocation12_spill]] %s1632_s21  ;;  %s1732_s27 = sadd.s32 4294967295, %s1652_s26   ;;  %s1652_s26 = sphi %s1711_s26, %s25_s26   ;;  %s1648_s25 = sphi %s1709_s25, %s2116_s25   ;;  %s1644_s24 = sphi %s1707_s24, %s2115_s24   ;;  %s1640_s23 = sphi %s1705_s23, %s2119_s23   ;;  %s1636_s22 = sphi %s1703_s22, %s2118_s22   ;;  %s1632_s21 = sphi %s1701_s21, %s2117_s21  }
   0xb   : > { %2088 = sst [smem:[#allocation13_spill]] %s1648_s25  ;;  %s1228_s28 = sadd.s32 4294967294, %s1652_s26  }
   0xc   : > { %2089 = sst [smem:[#allocation14_spill]] %s1652_s26  ;;  %s37_s29 = sadd.s32 1, %s1648_s25 }
   0xd   : > { %s46_s30 = sadd.s32 1, %s1640_s23  ;;  %p39_p0 = scmp.ge.s32.totalorder %s37_s29, 2 }
   0xe   : > { %p53_p1 = scmp.ne.s32.totalorder %s1640_s23, %s1636_s22  ;;  %p54_p2 = scmp.eq.s32.totalorder %s1652_s26, 0 }
   0xf   : > { %p59_p3 = scmp.ne.s32.totalorder %s1636_s22, %s1632_s21  ;;  %s2121_s29 = smov (%p39_p0, %s37_s29), 0 }
  0x10   : > { %2090 = sst [smem:[#allocation15_spill]] %s2121_s29  ;;  %p1744_p4 = por %p54_p2, %p53_p1 }
  0x11   : > { %p60_p5 = scmp.eq.s32.totalorder %s1732_s27, 0  ;;  %s41_s8 = ssub.s32 %s1648_s25, %s2121_s29 }
  0x12   : > { %p214_p6 = scmp.eq.s32.totalorder %s1732_s27, 1  ;;  %p44_p7 = scmp.eq.s32.totalorder %s41_s8, 0 }
  0x13   : > { %p1752_p8 = por %p60_p5, %p59_p3  ;;  %p220_p10 = scmp.eq.s32.totalorder %s1228_s28, 1 }
  0x14   : > { %p1756_p9 = por %p214_p6, %p53_p1  ;;  %p1371_p13 = scmp.lt.s32.totalorder %s1652_s26, 2 }
  0x15   : > { %s2092_s9 = scalar_select %p1752_p8, 1, 0 }
  0x16   : > { %s2093_s10 = scalar_select %p1756_p9, 1, 0 }
  0x17   : > { %s1761_s11 = scalar_select %p44_p7, %s1640_s23, %s46_s30  }
  0x18   : > { %p1763_p11 = por %p220_p10, %p59_p3  ;;  %s2073_s13 = sand.u32 1, %s1640_s23  }
  0x19   : > { %2094 = sst [smem:[#allocation16_spill]] %s1761_s11  ;;  %s1772_s14 = sshll.u32 %s2073_s13, 5 }
  0x1a   : > { %s2095_s12 = scalar_select %p1763_p11, 1, 0 }
  0x1b   : > { %s1775_s15 = sshll.u32 %s1648_s25, 9  ;;  %p1779_p0 = pnand %p1371_p13, %p1744_p4 }
  0x1c   : > { %2096 = sst [smem:[#allocation17_spill]] %s2095_s12  ;;  %s266_s17 = sand.u32 1, %s1652_s26  }
  0x1d   : > { %s2098_s1 = sld [smem:[#allocation18_spill]]  ;;  %s270_s28 = scalar_lea.vmem [#allocation5], %s1772_s14 }
  0x1e   : > { %s277_s30 = sshll.u32 %s270_s28, 4  ;;  %s1795_s7 = scalar_lea.sflag [#allocation6], %s266_s17  ;;  %s1792_s30 = int_to_ptr.vmem [resolvable:$true] %s277_s30 }
  0x1f   : > { %p1801_p4 = pneg %p1779_p0 }
  0x23   : > { %s1788_s20 = scalar_lea.hbm %s2098_s1, %s1775_s15  ;;  %s1481_s28 = scalar_lea.hbm %s2098_s1, 1024 }
  0x24   : > { %s1476_s8 = scalar_lea.hbm %s1788_s20, 512  ;;  %p1482_p7 = scmp.lt.u32.totalorder %s1788_s20, %s2098_s1 }
  0x25   : > { %p1477_p3 = scmp.ne.s32.totalorder %s1788_s20, %s1476_s8  ;;  %p1483_p10 = scmp.lt.u32.totalorder %s1481_s28, %s1476_s8 }
  0x26   : > { %p1485_p12 = scmp.lt.u32.totalorder %s1476_s8, %s1788_s20 }
  0x27   : > { %p1479_p5 = pnand %p1801_p4, %p1477_p3  ;;  %p1484_p13 = por %p1483_p10, %p1482_p7 }
  0x29   : > { %p1480_p6 = pneg %p1479_p5  ;;  %p1486_p1 = por %p1485_p12, %p1484_p13 }
  0x2b   : > { %p1487_p2 = pnand %p1486_p1, %p1480_p6 }
  0x2d   : > { %1490 = shalt.err (!%p1487_p2)
}
  0x2e   : > { %s1491_s17 = scalar_lea.vmem %s1792_s30, 512  ;;  %s1654_s18 = smov [#allocation5]  }
  0x2f   : > { %p1492_p3 = scmp.ne.s32.totalorder %s1792_s30, %s1491_s17  ;;  %s1496_s19 = sshll.u32 %s1654_s18, 4  ;;  %s1497_s19 = int_to_ptr.vmem [resolvable:$false] %s1496_s19 }
  0x30   : > { %s1498_s25 = scalar_lea.vmem %s1497_s19, 1024  ;;  %p1499_p9 = scmp.lt.s32.totalorder %s1792_s30, %s1497_s19 }
  0x31   : > { %p1494_p5 = pnand %p1492_p3, %p1801_p4  ;;  %p1500_p8 = scmp.lt.s32.totalorder %s1498_s25, %s1491_s17 }
  0x33   : > { %p1495_p11 = pneg %p1494_p5  ;;  %p1501_p7 = por %p1500_p8, %p1499_p9 }
  0x35   : > { %p1502_p10 = pnand %p1501_p7, %p1495_p11 }
  0x37   : > { %1505 = shalt.err (!%p1502_p10)
}
  0x38   : > { %s2078_s29 = smov 64   ;;  %s2080_s8 = smov 4  }
  0x39   : > { %1363 = dma.hbm_to_vmem [thread:$0]  (!%p1779_p0), %s1788_s20, 512, %s1792_s30, %s1795_s7, %s2078_s29, %s2078_s29, %s2080_s8  }
  0x3a   : > { %p2100_p8 = scmp.lt.s32.totalorder %s1652_s26, 3  ;;  %p2101_p9 = scmp.ge.s32.totalorder %s1652_s26, 1 }
  0x3b   : > { %s1840_s19 = scalar_lea.hbm %s2066_s0, %s1775_s15  ;;  %s247_s25 = scalar_lea.vmem [#allocation2], %s1772_s14 }
  0x3c   : > { %p1832_p11 = pnand %p2101_p9, %p2100_p8  ;;  %s256_s1 = sshll.u32 %s247_s25, 4  ;;  %s1843_s1 = int_to_ptr.vmem [resolvable:$true] %s256_s1 }
  0x3d   : > { %s1849_s29 = scalar_lea.hbm %s2068_s2, %s1775_s15  ;;  %s2103_s8 = sand.u32 1, %s1640_s23  }
  0x3e   : > { %s2102_s28 = scalar_select %p1832_p11, 1, 0 }
  0x3f   : > { %s1853_s11 = scalar_lea.sflag [#allocation3], %s2103_s8  ;;  %s1506_s26 = scalar_lea.hbm %s1840_s19, 512 }
  0x40   : > { %p1507_p12 = scmp.ne.s32.totalorder %s1840_s19, %s1506_s26  ;;  %s1511_s12 = scalar_lea.hbm %s2066_s0, 1024 }
  0x41   : > { %p1512_p6 = scmp.lt.u32.totalorder %s1840_s19, %s2066_s0  ;;  %p1513_p13 = scmp.lt.u32.totalorder %s1511_s12, %s1506_s26 }
  0x42   : > { %p1509_p1 = pnand %p1507_p12, %p1801_p4  ;;  %p1515_p5 = scmp.lt.u32.totalorder %s1506_s26, %s1840_s19 }
  0x43   : > { %p1514_p3 = por %p1513_p13, %p1512_p6 }
  0x44   : > { %p1510_p2 = pneg %p1509_p1 }
  0x45   : > { %p1516_p7 = por %p1515_p5, %p1514_p3 }
  0x47   : > { %p1517_p10 = pnand %p1516_p7, %p1510_p2 }
  0x49   : > { %1520 = shalt.err (!%p1517_p10)
}
  0x4a   : > { %s1521_s15 = scalar_lea.vmem %s1843_s1, 512  ;;  %s1657_s8 = smov [#allocation2]  }
  0x4b   : > { %p1522_p8 = scmp.ne.s32.totalorder %s1843_s1, %s1521_s15  ;;  %s1526_s20 = sshll.u32 %s1657_s8, 4  ;;  %s1527_s20 = int_to_ptr.vmem [resolvable:$false] %s1526_s20 }
  0x4c   : > { %s1528_s21 = scalar_lea.vmem %s1527_s20, 1024  ;;  %p1529_p1 = scmp.lt.s32.totalorder %s1843_s1, %s1527_s20 }
  0x4d   : > { %p1524_p9 = pnand %p1522_p8, %p1801_p4  ;;  %p1530_p11 = scmp.lt.s32.totalorder %s1528_s21, %s1521_s15 }
  0x4f   : > { %p1525_p12 = pneg %p1524_p9  ;;  %p1531_p6 = por %p1530_p11, %p1529_p1 }
  0x51   : > { %p1532_p13 = pnand %p1531_p6, %p1525_p12 }
  0x53   : > { %1535 = shalt.err (!%p1532_p13)
}
  0x54   : > { %s2104_s26 = smov 4   ;;  %s2105_s12 = smov 64  }
  0x55   : > { %1360 = dma.hbm_to_vmem [thread:$0]  (!%p1779_p0), %s1840_s19, 512, %s1843_s1, %s1853_s11, %s2105_s12, %s2105_s12, %s2104_s26  }
  0x56   : > { %s291_s30 = scalar_lea.vmem [#allocation7], %s1772_s14  ;;  %s1536_s18 = scalar_lea.hbm %s1849_s29, 512 }
  0x57   : > { %s298_s17 = sshll.u32 %s291_s30, 4  ;;  %p1537_p11 = scmp.ne.s32.totalorder %s1849_s29, %s1536_s18  ;;  %s1881_s17 = int_to_ptr.vmem [resolvable:$true] %s298_s17 }
  0x58   : > { %s1541_s8 = scalar_lea.hbm %s2068_s2, 1024  ;;  %p1542_p5 = scmp.lt.u32.totalorder %s1849_s29, %s2068_s2 }
  0x59   : > { %p1539_p2 = pnand %p1537_p11, %p1801_p4  ;;  %p1543_p7 = scmp.lt.u32.totalorder %s1541_s8, %s1536_s18 }
  0x5a   : > { %p1545_p8 = scmp.lt.u32.totalorder %s1536_s18, %s1849_s29 }
  0x5b   : > { %p1540_p3 = pneg %p1539_p2  ;;  %p1544_p10 = por %p1543_p7, %p1542_p5 }
  0x5d   : > { %p1546_p9 = por %p1545_p8, %p1544_p10 }
  0x5f   : > { %p1547_p12 = pnand %p1546_p9, %p1540_p3 }
  0x61   : > { %1550 = shalt.err (!%p1547_p12)
}
  0x62   : > { %s1551_s1 = scalar_lea.vmem %s1881_s17, 512  ;;  %s1658_s11 = smov [#allocation7]  }
  0x63   : > { %p1552_p1 = scmp.ne.s32.totalorder %s1881_s17, %s1551_s1  ;;  %s1556_s14 = sshll.u32 %s1658_s11, 4  ;;  %s1557_s14 = int_to_ptr.vmem [resolvable:$false] %s1556_s14 }
  0x64   : > { %s1558_s19 = scalar_lea.vmem %s1557_s14, 1024  ;;  %p1559_p11 = scmp.lt.s32.totalorder %s1881_s17, %s1557_s14 }
  0x65   : > { %p1554_p6 = pnand %p1552_p1, %p1801_p4  ;;  %p1560_p2 = scmp.lt.s32.totalorder %s1558_s19, %s1551_s1 }
  0x67   : > { %p1555_p13 = pneg %p1554_p6  ;;  %p1561_p5 = por %p1560_p2, %p1559_p11 }
  0x69   : > { %p1562_p7 = pnand %p1561_p5, %p1555_p13 }
  0x6b   : > { %1565 = shalt.err (!%p1562_p7)
}
  0x6c   : > { %1366 = dma.hbm_to_vmem [thread:$0]  (!%p1779_p0), %s1849_s29, 512, %s1881_s17, %s1795_s7, %s2105_s12, %s2105_s12, %s2104_s26  }
  0x6d   : > { %p2106_p4 = scmp.ne.s32.totalorder %s2102_s28, 0 }
  0x6e   : > { %s1911_s13 = sand.u32 (!%p2106_p4), 1, %s1636_s22   ;;  %p2107_p3 = scmp.ne.s32.totalorder (!%p2106_p4), %s2092_s9, 0 }
  0x6f   : > { %336 = sbr.rel (%p2106_p4) target bundleno = 916 (0x394), region = 44  ;;  %s1914_s30 = sshll.u32 (!%p2106_p4), %s1911_s13, 5 }
  0x70   : > { %s339_s16 = scalar_lea.sflag (!%p2106_p4), [#allocation3], %s1911_s13  ;;  %s1918_s18 = scalar_lea.vmem (!%p2106_p4), [#allocation2], %s1914_s30 }
  0x76   : > { %1619 = dma.done.wait (%p2107_p3), %s339_s16, 512  }
  0x77   : > { %1621 = vsyncadd (%p2107_p3), %s339_s16, 4294966784  ;;  %s347_s7 = sand.u32 1, %s1732_s27   ;;  %s351_s28 = scalar_lea.vmem [#allocation5], %s1914_s30 }
  0x78   : > { %s348_s29 = scalar_lea.sflag [#allocation6], %s347_s7 }
  0x79   : > { %1623 = dma.done.wait (%p2107_p3), %s348_s29, 1024  }
  0x7a   : > { %1625 = vsyncadd (%p2107_p3), %s348_s29, 4294966272  ;;  %v1659_v0 = vmov 0.0   ;;  %p419_p0 = scmp.lt.s32.totalorder %s1644_s24, 1  ;;  %vm1660_vm0 = vmmov 0   ;;  %v1661_v1 = vmov 0   ;;  %v1662_v2 = vmov 1  }
  0x7b   : > { %1301 = vmatprep.subr.bf16.mxu0 %v1659_v0  ;;  %1307 = vmatprep.subr.bf16.mxu1 %v1659_v0  ;;  %vm492_vm1 = vcmask 261120   ;;  %v1432_v3 = vld [vmem:[%s351_s28] sm:$0xff]   ;;  %v1433_v4 = vld [vmem:[%s351_s28 + $0x8] sm:$0xff]   ;;  %v1436_v7 = vld [vmem:[%s351_s28 + $0x10] sm:$0xff]   ;;  %vm735_vm2 = vcmask 130048   ;;  %s1989_s21 = scalar_lea.vmem [#allocation7], %s1914_s30 }
  0x7c   : > { %1303 = vmatprep.mubr.msk.bf16.mxu0 %vm1660_vm0, %v1659_v0  ;;  %1309 = vmatprep.mubr.msk.bf16.mxu1 %vm1660_vm0, %v1659_v0  ;;  %s1938_s27 = scalar_select %p419_p0, %s1644_s24, 1  ;;  %v497_v5 = vsel %vm492_vm1, %v1432_v3, 0  ;;  %v554_v6 = vsel %vm492_vm1, %v1433_v4, 0  ;;  %v1437_v8 = vld [vmem:[%s351_s28 + $0x18] sm:$0xff]   ;;  %v1434_v9 = vld [vmem:[%s1918_s18] sm:$0xff]   ;;  %v1435_v10 = vld [vmem:[%s1918_s18 + $0x8] sm:$0xff]  }
  0x7d   : > { %1430 = vset.pattern.permute.xlu1 %v1661_v1  ;;  %1429 = vset.pattern.permute.xlu0 %v1662_v2  ;;  %v611_v11 = vsel %vm492_vm1, %v1436_v7, 0  ;;  %v668_v13 = vsel %vm492_vm1, %v1437_v8, 0  ;;  %v1438_v15 = vld [vmem:[%s1918_s18 + $0x10] sm:$0xff]   ;;  %v1439_v16 = vld [vmem:[%s1918_s18 + $0x18] sm:$0xff]   ;;  %s1244_s1 = sshll.u32 %s1911_s13, 4  ;;  %s1280_s19 = sshll.u32 %s1644_s24, 8 }
  0x7e   : > { %s1279_s9 = sshll.u32 %s1938_s27, 4  ;;  %1302 = vmatpush3.bf16.xpose.msra.mxu0 %v497_v5  ;;  %1308 = vmatpush3.bf16.xpose.msra.mxu1 %v554_v6  ;;  %s1278_s25 = sshll.u32 %s1938_s27, 3 }
  0x7f   : > { %1313 = vmatprep.subr.bf16.mxu0 %v1659_v0  ;;  %1319 = vmatprep.subr.bf16.mxu1 %v1659_v0  ;;  %s436_s17 = scalar_lea.vmem %s2070_s4, %s1279_s9  ;;  %s426_s20 = scalar_lea.vmem %s2069_s3, %s1278_s25 }
  0x80   : > { %v464_v12 = vld [vmem:[%s436_s17] sm:$0xff]  ;;  %v465_v14 = vld [vmem:[%s436_s17 + $0x8] sm:$0xff]  ;;  %s416_s30 = scalar_lea.vmem [#allocation8], %s1244_s1  ;;  %s2013_s29 = scalar_lea.hbm %s2072_s6, %s1280_s19 }
  0x81   : > { %712 = vperm.xlu1 %1430, %v464_v12   ;;  %472 = vperm.xlu0 %1429, %v464_v12   ;;  %v1282_v17 = vld [vmem:[%s426_s20] sm:$0xff]   ;;  %s1061_s16 = sshll.u32 %s416_s30, 4  ;;  %s1046_s24 = scalar_lea.sflag [#allocation4], %s1911_s13  ;;  %s2015_s16 = int_to_ptr.vmem [resolvable:$true] %s1061_s16 }
  0x82   : > { %v1283_v20 = vunpack.c.l.bf16 %v1282_v17  ;;  %v1284_v23 = vunpack.c.h.bf16 %v1282_v17  ;;  %s1566_s28 = scalar_lea.vmem %s2015_s16, 256  ;;  %p2108_p8 = scmp.ne.s32.totalorder %s2093_s10, 0 }
  0x83   : > { %p1567_p10 = scmp.ne.s32.totalorder %s2015_s16, %s1566_s28  ;;  %s1663_s27 = smov [#allocation8]  }
  0x84   : > { %s1570_s9 = sshll.u32 %s1663_s27, 4  ;;  %s1571_s9 = int_to_ptr.vmem [resolvable:$false] %s1570_s9 }
  0x85   : > { %1304 = vmatmul.mubr.msk.bf16.vlgmr.msra.gmra.mrb[0].mxu0 %vm492_vm1, %v1434_v9  ;;  %1310 = vmatmul.mubr.msk.bf16.vlgmr.msra.gmra.mrb[0].mxu1 %vm492_vm1, %v1435_v10  ;;  %p1568_p9 = pnand %p1567_p10, %p2108_p8  ;;  %s1572_s26 = scalar_lea.vmem %s1571_s9, 512 }
  0x86   : > { %1314 = vmatpush3.bf16.xpose.msra.mxu0 %v611_v11  ;;  %1320 = vmatpush3.bf16.xpose.msra.mxu1 %v668_v13  ;;  %p1573_p1 = scmp.lt.s32.totalorder %s2015_s16, %s1571_s9  ;;  %p1574_p6 = scmp.lt.s32.totalorder %s1572_s26, %s1566_s28 }
  0x87   : > { %1315 = vmatprep.mubr.msk.bf16.mxu0 %vm1660_vm0, %v1659_v0  ;;  %1321 = vmatprep.mubr.msk.bf16.mxu1 %vm1660_vm0, %v1659_v0  ;;  %p1569_p12 = pneg %p1568_p9 }
  0x88   : > { %716 = vperm.xlu1 %1430, %v465_v14   ;;  %477 = vperm.xlu0 %1429, %v465_v14   ;;  %p1575_p13 = por %p1574_p6, %p1573_p1 }
  0x89   : > { %1325 = vmatprep.subr.bf16.mxu0 %v1659_v0  ;;  %1331 = vmatprep.subr.bf16.mxu1 %v1659_v0 }
  0x8a   : > { %p1576_p11 = pnand %p1575_p13, %p1569_p12 }
  0x8c   : > { %1431 = vset.pattern.permute.xlu0 %v1661_v1 }
  0x8d   : > { %1316 = vmatmul.mubr.msk.bf16.vlgmr.msra.gmra.mrb[4].mxu0 %vm492_vm1, %v1438_v15  ;;  %1322 = vmatmul.mubr.msk.bf16.vlgmr.msra.gmra.mrb[4].mxu1 %vm492_vm1, %v1439_v16 }
  0x8e   : > { %1327 = vmatprep.mubr.msk.bf16.mxu0 %vm1660_vm0, %v1659_v0  ;;  %1333 = vmatprep.mubr.msk.bf16.mxu1 %vm1660_vm0, %v1659_v0 }
 0x100   : > { %v713_v18 = vpop.permute.xlu1 %712  ;;  %v473_v19 = vpop.permute.xlu0 %472 }
 0x101   : > { %v480_v21 = vmul.f32 %v1283_v20, %v473_v19 }
 0x107   : > { %v717_v22 = vpop.permute.xlu1 %716  ;;  %v478_v24 = vpop.permute.xlu0 %477 }
 0x108   : > { %v481_v32 = vmul.f32 %v1284_v23, %v478_v24 }
 0x158   : > { %v533_v25 = vpop.f32.mrb[0].mxu0  ;;  %v590_v27 = vpop.f32.mrb[0].mxu1 }
 0x159   : > { %v719_v26 = vmul.f32 %v713_v18, %v533_v25  ;;  %v1305_v28 = vpop.f32.mrb[1].mxu0  ;;  %v721_v29 = vmul.f32 %v713_v18, %v590_v27  ;;  %v1311_v30 = vpop.f32.mrb[1].mxu1 }
 0x15a   : > { %v536_v31 = vpop.f32.mrb[2].mxu0  ;;  %v593_v34 = vpop.f32.mrb[2].mxu1 }
 0x15b   : > { %v720_v33 = vmul.f32 %v717_v22, %v536_v31  ;;  %v1306_v35 = vpop.f32.mrb[3].mxu0  ;;  %v727_v36 = vadd.f32 %v719_v26, %v480_v21  ;;  %v722_v37 = vmul.f32 %v717_v22, %v593_v34  ;;  %v1312_v38 = vpop.f32.mrb[3].mxu1  ;;  %v729_v39 = vadd.f32 %v721_v29, %v480_v21 }
 0x15d   : > { %v736_v40 = vsel %vm735_vm2, %v727_v36, -inf  ;;  %v728_v41 = vadd.f32 %v720_v33, %v481_v32  ;;  %v730_v42 = vadd.f32 %v722_v37, %v481_v32  ;;  %v742_v48 = vsel %vm735_vm2, %v729_v39, -inf }
 0x15e   : > { %737 = vmax.xlane.f32.xlu0 %v736_v40 }
 0x15f   : > { %v739_v43 = vsel %vm735_vm2, %v728_v41, -inf  ;;  %v745_v59 = vsel %vm735_vm2, %v730_v42, -inf }
 0x160   : > { %740 = vmax.xlane.f32.xlu1 %v739_v43  ;;  %v647_v44 = vpop.f32.mrb[4].mxu0  ;;  %v704_v45 = vpop.f32.mrb[4].mxu1  ;;  %v1440_v43 = vld [vmem:[%s1989_s21] sm:$0xff]  }
 0x161   : > { %v723_v46 = vmul.f32 %v713_v18, %v647_v44  ;;  %v1317_v47 = vpop.f32.mrb[5].mxu0  ;;  %v725_v49 = vmul.f32 %v713_v18, %v704_v45  ;;  %v1323_v50 = vpop.f32.mrb[5].mxu1  ;;  %1326 = vmatpush3.bf16.msra.mxu0 %v1440_v43  ;;  %v1441_v44 = vld [vmem:[%s1989_s21 + $0x8] sm:$0xff]  }
 0x162   : > { %743 = vmax.xlane.f32.xlu0 %v742_v48  ;;  %v650_v51 = vpop.f32.mrb[6].mxu0  ;;  %v707_v52 = vpop.f32.mrb[6].mxu1  ;;  %1337 = vmatprep.subr.bf16.mxu0 %v1659_v0 }
 0x163   : > { %v724_v53 = vmul.f32 %v717_v22, %v650_v51  ;;  %v1318_v54 = vpop.f32.mrb[7].mxu0  ;;  %v731_v55 = vadd.f32 %v723_v46, %v480_v21  ;;  %v726_v56 = vmul.f32 %v717_v22, %v707_v52  ;;  %v1324_v57 = vpop.f32.mrb[7].mxu1  ;;  %v733_v58 = vadd.f32 %v725_v49, %v480_v21  ;;  %1332 = vmatpush3.bf16.msra.mxu1 %v1441_v44 }
 0x164   : > { %1343 = vmatprep.subr.bf16.mxu1 %v1659_v0 }
 0x165   : > { %v748_v60 = vsel %vm735_vm2, %v731_v55, -inf  ;;  %v732_v61 = vadd.f32 %v724_v53, %v481_v32  ;;  %v734_v62 = vadd.f32 %v726_v56, %v481_v32  ;;  %v754_v63 = vsel %vm735_vm2, %v733_v58, -inf  ;;  %v1442_v56 = vld [vmem:[%s1989_s21 + $0x10] sm:$0xff]  }
 0x166   : > { %746 = vmax.xlane.f32.xlu0 %v745_v59  ;;  %749 = vmax.xlane.f32.xlu1 %v748_v60 }
 0x167   : > { %v751_v1 = vsel %vm735_vm2, %v732_v61, -inf  ;;  %v757_v2 = vsel %vm735_vm2, %v734_v62, -inf }
 0x16a   : > { %755 = vmax.xlane.f32.xlu1 %v754_v63  ;;  %752 = vmax.xlane.f32.xlu0 %v751_v1  ;;  %v1443_v63 = vld [vmem:[%s1989_s21 + $0x18] sm:$0xff]  }
 0x16e   : > { %758 = vmax.xlane.f32.xlu0 %v757_v2 }
 0x1eb   : > { %v738_v3 = vpop.xlane.xlu0 %737 }
 0x1ec   : > { %v760_v4 = vsub.f32 %v727_v36, %v738_v3 }
 0x1ed   : > { %v741_v5 = vpop.xlane.xlu1 %740 }
 0x1ee   : > { %v768_v6 = vmul.f32 1.442695, %v760_v4  ;;  %v761_v7 = vsub.f32 %v728_v41, %v741_v5 }
 0x1ef   : > { %v744_v8 = vpop.xlane.xlu0 %743 }
 0x1f0   : > { %1444 = vpow2.f32 %v768_v6  ;;  %v770_v9 = vmul.f32 1.442695, %v761_v7  ;;  %v762_v10 = vsub.f32 %v729_v39, %v744_v8 }
 0x1f2   : > { %1446 = vpow2.f32 %v770_v9  ;;  %v772_v11 = vmul.f32 1.442695, %v762_v10 }
 0x1f3   : > { %v747_v12 = vpop.xlane.xlu0 %746  ;;  %v750_v13 = vpop.xlane.xlu1 %749 }
 0x1f4   : > { %1448 = vpow2.f32 %v772_v11  ;;  %v763_v14 = vsub.f32 %v730_v42, %v747_v12  ;;  %v764_v15 = vsub.f32 %v731_v55, %v750_v13 }
 0x1f6   : > { %v774_v16 = vmul.f32 1.442695, %v763_v14  ;;  %v776_v17 = vmul.f32 1.442695, %v764_v15 }
 0x1f7   : > { %v756_v18 = vpop.xlane.xlu1 %755  ;;  %v753_v19 = vpop.xlane.xlu0 %752 }
 0x1f8   : > { %1450 = vpow2.f32 %v774_v16  ;;  %v766_v20 = vsub.f32 %v733_v58, %v756_v18  ;;  %v765_v21 = vsub.f32 %v732_v61, %v753_v19 }
 0x1f9   : > { %1452 = vpow2.f32 %v776_v17 }
 0x1fa   : > { %v1445_v22 = vpop.eup %1444  ;;  %v780_v23 = vmul.f32 1.442695, %v766_v20  ;;  %v778_v24 = vmul.f32 1.442695, %v765_v21 }
 0x1fb   : > { %v759_v25 = vpop.xlane.xlu0 %758  ;;  %v784_v26 = vsel %vm735_vm2, %v1445_v22, 0.0 }
 0x1fc   : > { %v1447_v27 = vpop.eup %1446  ;;  %1454 = vpow2.f32 %v780_v23  ;;  %v767_v28 = vsub.f32 %v734_v62, %v759_v25  ;;  %785 = vadd.xlane.f32.xlu1 %v784_v26 }
 0x1fd   : > { %1456 = vpow2.f32 %v778_v24  ;;  %v787_v29 = vsel %vm735_vm2, %v1447_v27, 0.0 }
 0x1fe   : > { %v1449_v30 = vpop.eup %1448  ;;  %v782_v31 = vmul.f32 1.442695, %v767_v28  ;;  %788 = vadd.xlane.f32.xlu0 %v787_v29  ;;  %v1269_v28 = vld [vmem:[%s2071_s5] ss:$0 sm:$0xff] }
 0x1ff   : > { %v790_v32 = vsel %vm735_vm2, %v1449_v30, 0.0 }
 0x200   : > { %1458 = vpow2.f32 %v782_v31  ;;  %791 = vadd.xlane.f32.xlu1 %v790_v32 }
 0x202   : > { %v1451_v33 = vpop.eup %1450 }
 0x203   : > { %v1453_v34 = vpop.eup %1452  ;;  %v793_v35 = vsel %vm735_vm2, %v1451_v33, 0.0 }
 0x204   : > { %v796_v36 = vsel %vm735_vm2, %v1453_v34, 0.0  ;;  %794 = vadd.xlane.f32.xlu0 %v793_v35 }
 0x205   : > { %797 = vadd.xlane.f32.xlu1 %v796_v36 }
 0x206   : > { %v1455_v37 = vpop.eup %1454 }
 0x207   : > { %v1457_v38 = vpop.eup %1456  ;;  %v802_v39 = vsel %vm735_vm2, %v1455_v37, 0.0 }
 0x208   : > { %v799_v40 = vsel %vm735_vm2, %v1457_v38, 0.0 }
 0x209   : > { %803 = vadd.xlane.f32.xlu1 %v802_v39  ;;  %800 = vadd.xlane.f32.xlu0 %v799_v40 }
 0x20a   : > { %v1459_v41 = vpop.eup %1458 }
 0x20b   : > { %v805_v42 = vsel %vm735_vm2, %v1459_v41, 0.0 }
 0x20d   : > { %806 = vadd.xlane.f32.xlu0 %v805_v42 }
 0x289   : > { %v786_v45 = vpop.xlane.xlu1 %785 }
 0x28a   : > { %1460 = vrcp.f32 %v786_v45 }
 0x28b   : > { %v789_v46 = vpop.xlane.xlu0 %788 }
 0x28c   : > { %1462 = vrcp.f32 %v789_v46 }
 0x28d   : > { %v792_v47 = vpop.xlane.xlu1 %791 }
 0x28e   : > { %1464 = vrcp.f32 %v792_v47 }
 0x291   : > { %v795_v48 = vpop.xlane.xlu0 %794 }
 0x292   : > { %v798_v49 = vpop.xlane.xlu1 %797  ;;  %1466 = vrcp.f32 %v795_v48 }
 0x293   : > { %1468 = vrcp.f32 %v798_v49 }
 0x294   : > { %v1461_v50 = vpop.eup %1460 }
 0x295   : > { %v816_v54 = vmul.f32 %v1461_v50, %v1445_v22 }
 0x296   : > { %v1463_v51 = vpop.eup %1462  ;;  %v804_v52 = vpop.xlane.xlu1 %803 }
 0x297   : > { %v801_v53 = vpop.xlane.xlu0 %800  ;;  %v817_v55 = vmul.f32 %v1463_v51, %v1447_v27 }
 0x298   : > { %1470 = vrcp.f32 %v801_v53  ;;  %v1465_v58 = vpop.eup %1464 }
 0x299   : > { %1472 = vrcp.f32 %v804_v52  ;;  %v824_v57 = vpack.c.bf16 %v817_v55, %v816_v54  ;;  %v818_v61 = vmul.f32 %v1465_v58, %v1449_v30 }
 0x29b   : > { %v807_v59 = vpop.xlane.xlu0 %806  ;;  %1328 = vmatmul.mubr.msk.bf16.vlgmr.msra.gmra.mrb[8].mxu0 %vm735_vm2, %v824_v57 }
 0x29c   : > { %1474 = vrcp.f32 %v807_v59  ;;  %v1467_v60 = vpop.eup %1466  ;;  %1338 = vmatpush3.bf16.msra.mxu0 %v1442_v56  ;;  %1339 = vmatprep.mubr.msk.bf16.mxu0 %vm1660_vm0, %v1659_v0 }
 0x29d   : > { %v819_v62 = vmul.f32 %v1467_v60, %v1451_v33  ;;  %v1469_v2 = vpop.eup %1468 }
 0x29e   : > { %v820_v5 = vmul.f32 %v1469_v2, %v1453_v34 }
 0x29f   : > { %v825_v1 = vpack.c.bf16 %v819_v62, %v818_v61 }
 0x2a1   : > { %1334 = vmatmul.mubr.msk.bf16.vlgmr.msra.gmra.mrb[8].mxu1 %vm735_vm2, %v825_v1 }
 0x2a2   : > { %v1471_v3 = vpop.eup %1470  ;;  %1344 = vmatpush3.bf16.msra.mxu1 %v1443_v63  ;;  %1345 = vmatprep.mubr.msk.bf16.mxu1 %vm1660_vm0, %v1659_v0 }
 0x2a3   : > { %v1473_v4 = vpop.eup %1472  ;;  %v821_v6 = vmul.f32 %v1471_v3, %v1457_v38 }
 0x2a4   : > { %v822_v9 = vmul.f32 %v1473_v4, %v1455_v37 }
 0x2a5   : > { %v826_v8 = vpack.c.bf16 %v821_v6, %v820_v5 }
 0x2a6   : > { %v1475_v7 = vpop.eup %1474 }
 0x2a7   : > { %v823_v10 = vmul.f32 %v1475_v7, %v1459_v41  ;;  %1340 = vmatmul.mubr.msk.bf16.vlgmr.msra.gmra.mrb[12].mxu0 %vm735_vm2, %v826_v8 }
 0x2a9   : > { %v827_v11 = vpack.c.bf16 %v823_v10, %v822_v9 }
 0x2ab   : > { %1346 = vmatmul.mubr.msk.bf16.vlgmr.msra.gmra.mrb[12].mxu1 %vm735_vm2, %v827_v11 }
 0x36e   : > { %v871_v12 = vpop.f32.mrb[8].mxu0 }
 0x36f   : > { %v1329_v13 = vpop.f32.mrb[9].mxu0 }
 0x370   : > { %v874_v14 = vpop.f32.mrb[10].mxu0 }
 0x371   : > { %v1330_v15 = vpop.f32.mrb[11].mxu0 }
 0x374   : > { %v921_v16 = vpop.f32.mrb[8].mxu1 }
 0x375   : > { %v1028_v17 = vadd.f32 %v921_v16, %v871_v12  ;;  %v1335_v0 = vpop.f32.mrb[9].mxu1 }
 0x376   : > { %v924_v18 = vpop.f32.mrb[10].mxu1 }
 0x377   : > { %v1031_v19 = vadd.f32 %v924_v18, %v874_v14  ;;  %v1336_v20 = vpop.f32.mrb[11].mxu1 }
 0x37a   : > { %v971_v21 = vpop.f32.mrb[12].mxu0 }
 0x37b   : > { %v1029_v22 = vadd.f32 %v1028_v17, %v971_v21  ;;  %v1341_v23 = vpop.f32.mrb[13].mxu0 }
 0x37c   : > { %v974_v24 = vpop.f32.mrb[14].mxu0 }
 0x37d   : > { %v1032_v25 = vadd.f32 %v1031_v19, %v974_v24  ;;  %v1342_v26 = vpop.f32.mrb[15].mxu0 }
 0x37e   : > { %v1021_v27 = vpop.f32.mrb[12].mxu1 }
 0x37f   : > { %v1030_v29 = vadd.f32 %v1029_v22, %v1021_v27  ;;  %v1347_v30 = vpop.f32.mrb[13].mxu1 }
 0x380   : > { %v1024_v31 = vpop.f32.mrb[14].mxu1 }
 0x381   : > { %v1041_v32 = vadd.f32 %v1269_v28, %v1030_v29  ;;  %v1033_v33 = vadd.f32 %v1032_v25, %v1024_v31  ;;  %v1348_v34 = vpop.f32.mrb[15].mxu1 }
 0x383   : > { %1043 = vst.msk [vmem:[%s416_s30] sm:$0xff] %vm492_vm1, %v1041_v32  ;;  %v1042_v35 = vadd.f32 %v1269_v28, %v1033_v33 }
 0x385   : > { %1044 = vst.msk [vmem:[%s416_s30 + $0x8] sm:$0xff] %vm492_vm1, %v1042_v35 }
 0x386   : > { %1579 = shalt.err (!%p1576_p11)
}
 0x387   : > { %s1580_s12 = scalar_lea.hbm %s2013_s29, 256  ;;  %s1584_s15 = scalar_lea.hbm %s2072_s6, 512 }
 0x388   : > { %p1581_p2 = scmp.ne.s32.totalorder %s2013_s29, %s1580_s12  ;;  %p1585_p4 = scmp.lt.u32.totalorder %s2013_s29, %s2072_s6 }
 0x389   : > { %p1586_p3 = scmp.lt.u32.totalorder %s1584_s15, %s1580_s12  ;;  %p1588_p10 = scmp.lt.u32.totalorder %s1580_s12, %s2013_s29 }
 0x38a   : > { %p1582_p5 = pnand %p1581_p2, %p2108_p8 }
 0x38b   : > { %p1587_p0 = por %p1586_p3, %p1585_p4 }
 0x38c   : > { %p1583_p7 = pneg %p1582_p5 }
 0x38d   : > { %p1589_p9 = por %p1588_p10, %p1587_p0 }
 0x38f   : > { %p1590_p12 = pnand %p1589_p9, %p1583_p7 }
 0x391   : > { %1593 = shalt.err (!%p1590_p12)
}
 0x392   : > { %s1664_s21 = smov 128   ;;  %s1665_s1 = smov 8  }
 0x393   : > { %1355 = dma.vmem_to_hbm [thread:$0]  (%p2108_p8), %s2015_s16, 256, %s2013_s29, %s1046_s24, %s1664_s21, %s1664_s21, %s1665_s1  }
 0x394 PF: > { %s2109_s11 = sld [smem:[#allocation12_spill]]  ;;  %s2110_s14 = sld [smem:[#allocation17_spill]] }
 0x395   : > { %s2111_s19 = sld [smem:[#allocation14_spill]] }
 0x39a   : > { %s1076_s30 = sand.u32 1, %s2109_s11   ;;  %p2112_p1 = scmp.ne.s32.totalorder %s2110_s14, 0 }
 0x39b   : > { %p2113_p6 = scmp.ge.s32.totalorder %s2111_s19, 2  ;;  %s1077_s18 = scalar_lea.sflag [#allocation4], %s1076_s30 }
 0x39d   : > { %p1368_p13 = pnand %p2113_p6, %p2112_p1 }
 0x39f   : > { %1627 = dma.done.wait (!%p1368_p13), %s1077_s18, 256  }
 0x3a0   : > { %1629 = vsyncadd (!%p1368_p13), %s1077_s18, 4294967040  ;;  %s25_s26 = sadd.s32 1, %s2111_s19   ;;  %s2114_s7 = sld [smem:[#allocation16_spill]] }
 0x3a1   : > { %p22_p11 = scmp.ge.s32.totalorder %s25_s26, 4   ;;  %s2115_s24 = sld [smem:[#allocation13_spill]] }
 0x3a2   : > { %s2116_s25 = sld [smem:[#allocation15_spill]]  ;;  %s2117_s21 = smov %s1636_s22 }
 0x3a3   : > { %s2118_s22 = smov %s1640_s23  ;;  %24 = sbr.rel (!%p22_p11) target bundleno = 10 (0xa), region = 119 }
 0x3a6   : > { %s2119_s23 = smov %s2114_s7 }
 0x3aa   :  { %1082 = vsyncpa [#allocation3], 1 }
 0x3ab   :  { %1084 = vsyncpa [#allocation3 + $0x1], 1 }
 0x3ac   :  { %1085 = vsyncpa [#allocation6], 1 }
 0x3ad   :  { %1087 = vsyncpa [#allocation6 + $0x1], 1 }
 0x3ae   :  { %1088 = vsyncpa [#allocation4], 1 }
 0x3af   :  { %1090 = vsyncpa [#allocation4 + $0x1], 1 }

</bundles_post_ra>
